<compile_context>
chip_gen: v7x
topology: tpu7x:2x2x1
jax: 0.10.0
libtpu: 0.0.40
codegen_flags: <defaults>
</compile_context>

<pallas_src>
import jax
import jax.numpy as jnp
from jax.experimental import pallas as pl
from jax.experimental.pallas import tpu as pltpu

EMB_DIM = 768          # distilbert sentence-embedding dimension
SENT_LEN = 10          # sentence_len (Conv1d in-channels)
EMB_SIZE = 32          # emb_size (fc out_features)


def _round_up(x, m):
    return ((x + m - 1) // m) * m


def _sentence_encoder_kernel(emb_ref, wfc_ref, bfc_ref, wsel_ref, bconv_ref,
                             att_ref, out_ref):
    # emb_ref : (TM, 768)  compute_dtype  flattened sentence embeddings (row tile)
    # wfc_ref : (768, 128) compute_dtype  fc weight, zero-padded to 128 lanes
    # bfc_ref : (1, 128)   f32            fc bias, zero-padded
    # wsel_ref: (G, TM)    compute_dtype  conv weights baked into a group selector
    # bconv_ref: (1,)      f32 (SMEM)     conv bias scalar
    # att_ref : (TM, 128)  compute_dtype  lane-dense out_att slab
    # out_ref : (G, 128)   f32            lane-dense merged output

    # fc: Linear(768, emb_size) -> one large MXU matmul, f32 accumulation.
    att = jnp.dot(emb_ref[...], wfc_ref[...],
                  preferred_element_type=jnp.float32) + bfc_ref[...]
    att_ref[...] = att.astype(att_ref.dtype)

    # Conv1d(S, 1, 1): per-instance weighted sum over the S sentences, as a
    # single (G, TM) x (TM, 128) matmul with the conv weights scattered into
    # the selector (wsel[g, g*S + s] = w_conv[s]).  Source the second dot from
    # att_ref (already stored) rather than the live f32 value to avoid a
    # duplicate VMEM-resident copy / vreg spills.
    out = jnp.dot(wsel_ref[...], att_ref[...],
                  preferred_element_type=jnp.float32) + bconv_ref[0]
    out_ref[...] = out.astype(out_ref.dtype)


def _choose_row_tile(M, S):
    """Pick (TM, M_pad): TM a multiple of 8*S, capped near 2560 rows, and
    (when multi-tile) dividing the L-aligned row count to avoid a pad pass."""
    L = 8 * S                        # whole instances per chunk + sublane-8 rows
    cap = max((2560 // L) * L, L)    # ~2560-row tiles (multiple of 256 for S=10)
    M_pad = _round_up(M, L)
    if M_pad <= cap:
        # Enough work for two tiles -> let the "parallel" axis shard across
        # v7x's two TensorCores; otherwise a single full block (tiny case).
        if M_pad >= 2 * 1280 and (M_pad // 2) % L == 0:
            return M_pad // 2, M_pad
        return M_pad, M_pad
    # Prefer a TM that divides the L-aligned row count exactly so the wrapper
    # does not need an extra full-HBM jnp.pad pass over the input.
    tm = cap
    while tm >= L:
        if M_pad % tm == 0:
            return tm, M_pad
        tm -= L
    return cap, _round_up(M_pad, cap)


def sentence_encoder_forward(emb, w_fc, b_fc, w_conv, b_conv,
                             fusion_method="attention",
                             compute_dtype=jnp.bfloat16):
    """emb: (N, S, 768). Returns (out (N, E), out_att (N, S, E)) for
    fusion_method == 'attention', else out only."""
    N, S, D = emb.shape
    E = w_fc.shape[1]
    M = N * S

    # ---- padded / tiled geometry -------------------------------------------
    E_pad = _round_up(E, 128)            # lane-dense output width (keep 128)
    TM, M_pad = _choose_row_tile(M, S)
    G = TM // S                          # instances per row tile
    n_tiles = M_pad // TM

    # ---- wrapper-side data prep (plain JAX, cheap) -------------------------
    emb_flat = emb.reshape(M, D).astype(compute_dtype)
    emb_p = emb_flat if M_pad == M else jnp.pad(emb_flat, ((0, M_pad - M), (0, 0)))

    wfc_p = jnp.pad(w_fc.astype(compute_dtype), ((0, 0), (0, E_pad - E)))
    bfc_p = jnp.pad(b_fc.astype(jnp.float32).reshape(1, E),
                    ((0, 0), (0, E_pad - E)))

    # Selector matrix carrying the conv weights: out[g] = sum_s w[s]*att[g*S+s].
    r = jnp.arange(TM)
    g = jnp.arange(G)
    w_row = w_conv.astype(jnp.float32).reshape(-1)[r % S]        # (TM,)
    sel_mask = (r[None, :] // S) == g[:, None]                   # (G, TM)
    wsel = jnp.where(sel_mask, w_row[None, :], 0.0).astype(compute_dtype)

    bconv = b_conv.astype(jnp.float32).reshape(-1)[:1]           # (1,) SMEM scalar

    # Explicit VMEM budget: double-buffered inputs/outputs + resident weights,
    # plus headroom; bounded so it fits v7x's 64 MiB physical VMEM.
    cd_bytes = jnp.dtype(compute_dtype).itemsize
    vmem_bytes = 2 * (TM * D * cd_bytes          # emb tile
                      + TM * E_pad * cd_bytes    # out_att tile
                      + G * E_pad * 4            # out tile
                      + D * E_pad * cd_bytes     # fc weight
                      + E_pad * 4                # fc bias
                      + G * TM * cd_bytes)       # conv selector
    vmem_limit = int(min(max(vmem_bytes + (16 << 20), 32 << 20), 48 << 20))

    grid_spec = pltpu.PrefetchScalarGridSpec(
        num_scalar_prefetch=0,
        grid=(n_tiles,),
        in_specs=[
            pl.BlockSpec((TM, D), lambda i: (i, 0)),              # emb row tile
            pl.BlockSpec((D, E_pad), lambda i: (0, 0)),           # fc weight (resident)
            pl.BlockSpec((1, E_pad), lambda i: (0, 0)),           # fc bias
            pl.BlockSpec((G, TM), lambda i: (0, 0)),              # conv selector
            pl.BlockSpec(memory_space=pltpu.MemorySpace.SMEM),    # conv bias scalar
        ],
        out_specs=[
            pl.BlockSpec((TM, E_pad), lambda i: (i, 0)),          # out_att slab
            pl.BlockSpec((G, E_pad), lambda i: (i, 0)),           # merged out
        ],
    )

    out_att_p, out_p = pl.pallas_call(
        _sentence_encoder_kernel,
        out_shape=(
            jax.ShapeDtypeStruct((M_pad, E_pad), compute_dtype),
            jax.ShapeDtypeStruct((M_pad // S, E_pad), jnp.float32),
        ),
        grid_spec=grid_spec,
        compiler_params=pltpu.CompilerParams(
            dimension_semantics=("parallel",),
            vmem_limit_bytes=vmem_limit),
    )(emb_p, wfc_p, bfc_p, wsel, bconv)

    # Rows beyond N in the padded slabs hold bias-only garbage; slice them off.
    out_att = out_att_p[:M, :E].astype(jnp.float32).reshape(N, S, E)
    out = out_p[:N, :E]
    if fusion_method == "attention":
        return out, out_att
    return out


if __name__ == "__main__":
    key = jax.random.PRNGKey(0)
    k_tab, k_wfc, k_bfc, k_wc, k_bc, k_ids = jax.random.split(key, 6)

    num_instance = 2
    vocab = 16  # number of distinct sentence ids in the synthetic mapping

    # Synthetic stand-in for id_sentence_mapping + SentenceTransformer.encode:
    # a deterministic embedding table (id -> 768-d sentence embedding).
    sent_table = jax.random.normal(k_tab, (vocab, EMB_DIM), dtype=jnp.float32)

    # Deterministic parameters (shapes from the module's __init__).
    # fc: Linear(768, emb_size)  -> stored as (768, emb_size) for X @ W
    w_fc = jax.random.normal(k_wfc, (EMB_DIM, EMB_SIZE), dtype=jnp.float32) * 0.02
    b_fc = jax.random.normal(k_bfc, (1, EMB_SIZE), dtype=jnp.float32) * 0.02
    # merge_tenshot_fc: Conv1d(sentence_len, 1, 1) -> weight (1, S), bias (1, 1)
    w_conv = jax.random.normal(k_wc, (1, SENT_LEN), dtype=jnp.float32) * 0.1
    b_conv = jax.random.normal(k_bc, (1, 1), dtype=jnp.float32) * 0.1

    # Input: sentence-id tensor x of shape (num_instance, sentence_len)
    x_ids = jax.random.randint(k_ids, (num_instance, SENT_LEN), 0, vocab)

    # Glue (plain JAX): id -> synthetic sentence embedding, shape (N, S, 768)
    emb = sent_table[x_ids.reshape(-1)].reshape(num_instance, SENT_LEN, EMB_DIM)

    # Default (bf16 streaming) path.
    out, out_att = sentence_encoder_forward(emb, w_fc, b_fc, w_conv, b_conv,
                                            fusion_method="attention")
    jax.block_until_ready((out, out_att))

    # Pure-JAX f32 reference.
    ref_att = emb.reshape(-1, EMB_DIM) @ w_fc + b_fc
    ref_att = ref_att.reshape(num_instance, SENT_LEN, EMB_SIZE)
    ref_out = jnp.einsum("s,nse->ne", w_conv[0], ref_att) + b_conv[0]

    assert out.shape == (num_instance, EMB_SIZE)
    assert out_att.shape == (num_instance, SENT_LEN, EMB_SIZE)
    # bf16 inputs / bf16 out_att storage -> loose tolerance vs f32 reference.
    assert jnp.allclose(out_att, ref_att, atol=3e-2, rtol=3e-2)
    assert jnp.allclose(out, ref_out, atol=3e-2, rtol=3e-2)

    # Exact-path sanity check (f32 compute, tight tolerance).
    out32, out_att32 = sentence_encoder_forward(emb, w_fc, b_fc, w_conv, b_conv,
                                                fusion_method="attention",
                                                compute_dtype=jnp.float32)
    jax.block_until_ready((out32, out_att32))
    assert jnp.allclose(out_att32, ref_att, atol=1e-3)
    assert jnp.allclose(out32, ref_out, atol=1e-3)

    print("KERNEL_OK")
</pallas_src>

<mosaic_0001>
module attributes {stable_mosaic.version = 11 : i64} {
  func.func @_sentence_encoder_kernel(%arg0: i32, %arg1: memref<80x768xbf16, #tpu.memory_space<vmem>>, %arg2: memref<768x128xbf16, #tpu.memory_space<vmem>>, %arg3: memref<1x128xf32, #tpu.memory_space<vmem>>, %arg4: memref<8x80xbf16, #tpu.memory_space<vmem>>, %arg5: memref<1xf32, #tpu.memory_space<smem>>, %arg6: memref<80x128xbf16, #tpu.memory_space<vmem>>, %arg7: memref<8x128xf32, #tpu.memory_space<vmem>>) attributes {dimension_semantics = [#tpu.dimension_semantics<parallel>], iteration_bounds = array<i64: 1>, scalar_prefetch = 0 : i64, scratch_operands = 0 : i64, tpu.core_type = #tpu.core_type<tc>, window_params = [{transform_indices = @transform_0, window_bounds = array<i64: 80, 768>}, {pipeline_mode = #tpu.pipeline_mode<synchronous>, transform_indices = @transform_1, window_bounds = array<i64: 768, 128>}, {pipeline_mode = #tpu.pipeline_mode<synchronous>, transform_indices = @transform_2, window_bounds = array<i64: 1, 128>}, {pipeline_mode = #tpu.pipeline_mode<synchronous>, transform_indices = @transform_3, window_bounds = array<i64: 8, 80>}, {transform_indices = @transform_4, window_bounds = array<i64: 1>}, {transform_indices = @transform_5, window_bounds = array<i64: 80, 128>}, {transform_indices = @transform_6, window_bounds = array<i64: 8, 128>}]} {
    %c0 = arith.constant 0 : index
    %c0_0 = arith.constant 0 : index
    %0 = vector.load %arg1[%c0, %c0_0] : memref<80x768xbf16, #tpu.memory_space<vmem>>, vector<80x768xbf16>
    %c0_1 = arith.constant 0 : index
    %c0_2 = arith.constant 0 : index
    %1 = vector.load %arg2[%c0_1, %c0_2] : memref<768x128xbf16, #tpu.memory_space<vmem>>, vector<768x128xbf16>
    %cst = arith.constant dense<0.000000e+00> : vector<80x128xf32>
    %2 = tpu.matmul %0, %1, %cst {dimension_numbers = #tpu.dot_dimension_numbers<[1], [0], [0], [1], [0, 0, 1, 1], [], []>} : vector<80x768xbf16>, vector<768x128xbf16>, vector<80x128xf32> -> vector<80x128xf32>
    %c0_3 = arith.constant 0 : index
    %c0_4 = arith.constant 0 : index
    %3 = vector.load %arg3[%c0_3, %c0_4] : memref<1x128xf32, #tpu.memory_space<vmem>>, vector<1x128xf32>
    %4 = vector.broadcast %3 : vector<1x128xf32> to vector<80x128xf32>
    %5 = arith.addf %2, %4 : vector<80x128xf32>
    %6 = arith.truncf %5 : vector<80x128xf32> to vector<80x128xbf16>
    %c0_5 = arith.constant 0 : index
    %c0_6 = arith.constant 0 : index
    %7 = vector.load %arg6[%c0_5, %c0_6] : memref<80x128xbf16, #tpu.memory_space<vmem>>, vector<80x128xbf16>
    tpu.vector_store %arg6[%c0_5, %c0_6], %6 {strides = array<i32>} : memref<80x128xbf16, #tpu.memory_space<vmem>>, vector<80x128xbf16>,
    %c0_7 = arith.constant 0 : index
    %c0_8 = arith.constant 0 : index
    %8 = vector.load %arg4[%c0_7, %c0_8] : memref<8x80xbf16, #tpu.memory_space<vmem>>, vector<8x80xbf16>
    %c0_9 = arith.constant 0 : index
    %c0_10 = arith.constant 0 : index
    %9 = vector.load %arg6[%c0_9, %c0_10] : memref<80x128xbf16, #tpu.memory_space<vmem>>, vector<80x128xbf16>
    %cst_11 = arith.constant dense<0.000000e+00> : vector<8x128xf32>
    %10 = tpu.matmul %8, %9, %cst_11 {dimension_numbers = #tpu.dot_dimension_numbers<[1], [0], [0], [1], [0, 0, 1, 1], [], []>} : vector<8x80xbf16>, vector<80x128xbf16>, vector<8x128xf32> -> vector<8x128xf32>
    %c0_12 = arith.constant 0 : index
    %11 = memref.load %arg5[%c0_12] : memref<1xf32, #tpu.memory_space<smem>>
    %12 = vector.broadcast %11 : f32 to vector<8x128xf32>
    %13 = arith.addf %10, %12 : vector<8x128xf32>
    %c0_13 = arith.constant 0 : index
    %c0_14 = arith.constant 0 : index
    %14 = vector.load %arg7[%c0_13, %c0_14] : memref<8x128xf32, #tpu.memory_space<vmem>>, vector<8x128xf32>
    tpu.vector_store %arg7[%c0_13, %c0_14], %13 {strides = array<i32>} : memref<8x128xf32, #tpu.memory_space<vmem>>, vector<8x128xf32>,
    return
  }
  func.func @transform_0(%arg0: i32) -> (i32, i32) {
    %c0_i32 = arith.constant 0 : i32
    %c0_i32_0 = arith.constant 0 : i32
    return %arg0, %c0_i32 : i32, i32
  }
  func.func @transform_1(%arg0: i32) -> (i32, i32) {
    %c0_i32 = arith.constant 0 : i32
    %c0_i32_0 = arith.constant 0 : i32
    %c0_i32_1 = arith.constant 0 : i32
    return %c0_i32, %c0_i32_0 : i32, i32
  }
  func.func @transform_2(%arg0: i32) -> (i32, i32) {
    %c0_i32 = arith.constant 0 : i32
    %c0_i32_0 = arith.constant 0 : i32
    %c0_i32_1 = arith.constant 0 : i32
    return %c0_i32, %c0_i32_0 : i32, i32
  }
  func.func @transform_3(%arg0: i32) -> (i32, i32) {
    %c0_i32 = arith.constant 0 : i32
    %c0_i32_0 = arith.constant 0 : i32
    %c0_i32_1 = arith.constant 0 : i32
    return %c0_i32, %c0_i32_0 : i32, i32
  }
  func.func @transform_4(%arg0: i32) -> i32 {
    %c0_i32 = arith.constant 0 : i32
    %c0_i32_0 = arith.constant 0 : i32
    return %c0_i32 : i32
  }
  func.func @transform_5(%arg0: i32) -> (i32, i32) {
    %c0_i32 = arith.constant 0 : i32
    %c0_i32_0 = arith.constant 0 : i32
    return %arg0, %c0_i32 : i32, i32
  }
  func.func @transform_6(%arg0: i32) -> (i32, i32) {
    %c0_i32 = arith.constant 0 : i32
    %c0_i32_0 = arith.constant 0 : i32
    return %arg0, %c0_i32 : i32, i32
  }
}

</mosaic_0001>

<bundles_post_ra>
// kernel: tpu_custom_call.1
= control target key start
LH: loop header
LB: loop body
LE: loop exit
PB: predicated region body
PF: predicated region fallthrough
CT: control target
= control target key end

     0   :  { %13 = vsyncpa [#allocation4], 0  ;;  %s1648_s0 = inlined_call_operand.hbm [shape: bf16[80,768], index: 0, kind: input, shape index: {}]   ;;  %s1649_s1 = inlined_call_operand.hbm [shape: bf16[768,128], index: 1, kind: input, shape index: {}]   ;;  %s1650_s2 = inlined_call_operand.vmem [shape: f32[1,128], index: 2, kind: input, shape index: {}]   ;;  %s1651_s3 = inlined_call_operand.vmem [shape: bf16[8,80], index: 3, kind: input, shape index: {}]   ;;  %s1652_s4 = inlined_call_operand.<no memory space> [shape: f32[1], index: 4, kind: input, shape index: {}]   ;;  %s1653_s5 = inlined_call_operand.hbm [shape: bf16[80,128], index: 5, kind: output, shape index: {0}]   ;;  %s1654_s6 = inlined_call_operand.hbm [shape: f32[8,128], index: 6, kind: output, shape index: {1}]  }
   0x1   :  { %14 = vsyncpa [#allocation7], 0 }
   0x2   :  { %15 = vsyncpa [#allocation5], 0 }
   0x3   :  { %16 = vsyncpa [#allocation10], 0  ;;  %s1510_s21 = smov [#allocation3]   ;;  %s1414_s25 = scalar_lea.hbm %s1648_s0, 3840 }
   0x4   :  { %s22_s22 = sshll.u32 %s1510_s21, 4  ;;  %p1415_p0 = scmp.ne.s32.totalorder %s1648_s0, %s1414_s25  ;;  %s23_s22 = int_to_ptr.vmem [resolvable:$true] %s22_s22 }
   0x5   :  { %p1418_p1 = scmp.lt.u32.totalorder %s1414_s25, %s1648_s0 }
   0x7   :  { %p1420_p2 = pnand %p1418_p1, %p1415_p0 }
   0x9   :  { %1423 = shalt.err (!%p1420_p2)
}
   0xa   :  { %s1424_s30 = scalar_lea.vmem %s23_s22, 3840  ;;  %p1429_p4 = scmp.lt.s32.totalorder %s23_s22, %s23_s22 }
   0xb   :  { %p1425_p3 = scmp.ne.s32.totalorder %s23_s22, %s1424_s30  ;;  %p1430_p5 = scmp.lt.s32.totalorder %s1424_s30, %s1424_s30 }
   0xd   :  { %p1431_p6 = por %p1430_p5, %p1429_p4 }
   0xf   :  { %p1432_p7 = pnand %p1431_p6, %p1425_p3 }
  0x11   :  { %1435 = shalt.err (!%p1432_p7)
}
  0x12   :  { %s1511_s7 = smov 384   ;;  %s1512_s8 = smov 24  }
  0x13   :  { %28 = dma.hbm_to_vmem [thread:$0]  %s1648_s0, 3840, %s23_s22, [#allocation4], %s1511_s7, %s1511_s7, %s1512_s8  }
  0x14   :  { %s1513_s11 = smov [#allocation6]   ;;  %s1436_s15 = scalar_lea.hbm %s1649_s1, 6144 }
  0x15   :  { %s34_s12 = sshll.u32 %s1513_s11, 4  ;;  %p1437_p8 = scmp.ne.s32.totalorder %s1649_s1, %s1436_s15  ;;  %s35_s12 = int_to_ptr.vmem [resolvable:$true] %s34_s12 }
  0x16   :  { %p1440_p9 = scmp.lt.u32.totalorder %s1436_s15, %s1649_s1 }
  0x18   :  { %p1442_p10 = pnand %p1440_p9, %p1437_p8 }
  0x1a   :  { %1445 = shalt.err (!%p1442_p10)
}
  0x1b   :  { %s1446_s20 = scalar_lea.vmem %s35_s12, 6144  ;;  %p1451_p12 = scmp.lt.s32.totalorder %s35_s12, %s35_s12 }
  0x1c   :  { %p1447_p11 = scmp.ne.s32.totalorder %s35_s12, %s1446_s20  ;;  %p1452_p13 = scmp.lt.s32.totalorder %s1446_s20, %s1446_s20 }
  0x1e   :  { %p1453_p0 = por %p1452_p13, %p1451_p12 }
  0x20   :  { %p1454_p1 = pnand %p1453_p0, %p1447_p11 }
  0x22   :  { %1457 = shalt.err (!%p1454_p1)
}
  0x23   :  { %s1514_s0 = smov 64   ;;  %s1515_s21 = smov 4  }
  0x24   :  { %40 = dma.hbm_to_vmem [thread:$0]  %s1649_s1, 6144, %s35_s12, [#allocation7], %s1514_s0, %s1514_s0, %s1515_s21  }
  0x25   :  { %1502 = dma.done.wait [#allocation4], 3840  }
  0x26   :  { %1503 = vsyncadd [#allocation4], 4294963456 }
  0x27   :  { %1504 = dma.done.wait [#allocation7], 6144  }
  0x28   :  { %1505 = vsyncadd [#allocation7], 4294961152  ;;  %v1316_v0 = vld [vmem:[#allocation6 + $0x40] sm:$0xff]   ;;  %v1320_v4 = vld [vmem:[#allocation6 + $0x48] sm:$0xff]   ;;  %vm1517_vm0 = vmmov 0   ;;  %vm937_vm1 = vcmask 654336  }
  0x29   :  { %v1317_v1 = vld [vmem:[#allocation6] sm:$0xff]   ;;  %1148 = vmatprep.subr.bf16.mxu0 %v1316_v0  ;;  %v1321_v5 = vld [vmem:[#allocation6 + $0x8] sm:$0xff]   ;;  %v1324_v8 = vld [vmem:[#allocation6 + $0x50] sm:$0xff]   ;;  %s1518_s26 = smov [#allocation8]  }
  0x2a   :  { %v1318_v2 = vld [vmem:[#allocation6 + $0xc0] sm:$0xff]   ;;  %1149 = vmatpush3.bf16.msra.mxu0 %v1317_v1  ;;  %v1322_v6 = vld [vmem:[#allocation6 + $0xc8] sm:$0xff]   ;;  %v1325_v9 = vld [vmem:[#allocation6 + $0x10] sm:$0xff]   ;;  %s987_s27 = sshll.u32 %s1518_s26, 4  ;;  %s988_s27 = int_to_ptr.vmem [resolvable:$true] %s987_s27 }
  0x2b   :  { %v1319_v3 = vld [vmem:[#allocation6 + $0x80] sm:$0xff]   ;;  %1194 = vmatprep.subr.bf16.mxu1 %v1318_v2  ;;  %1150 = vmatprep.subr.bf16.mxu0 %v1320_v4  ;;  %v1323_v7 = vld [vmem:[#allocation6 + $0x88] sm:$0xff]   ;;  %v1326_v10 = vld [vmem:[#allocation6 + $0xd0] sm:$0xff]   ;;  %s1458_s28 = scalar_lea.vmem %s988_s27, 640  ;;  %p1463_p3 = scmp.lt.s32.totalorder %s988_s27, %s988_s27 }
  0x2c   :  { %1195 = vmatpush3.bf16.msra.mxu1 %v1319_v3  ;;  %v1327_v11 = vld [vmem:[#allocation6 + $0x90] sm:$0xff]   ;;  %v1328_v12 = vld [vmem:[#allocation6 + $0x58] sm:$0xff]   ;;  %v1332_v16 = vld [vmem:[#allocation6 + $0x60] sm:$0xff]   ;;  %p1459_p2 = scmp.ne.s32.totalorder %s988_s27, %s1458_s28  ;;  %p1464_p4 = scmp.lt.s32.totalorder %s1458_s28, %s1458_s28 }
  0x2d   :  { %1196 = vmatprep.subr.bf16.mxu1 %v1322_v6  ;;  %v1329_v13 = vld [vmem:[#allocation6 + $0x18] sm:$0xff]   ;;  %v1333_v17 = vld [vmem:[#allocation6 + $0x20] sm:$0xff]   ;;  %v1336_v20 = vld [vmem:[#allocation6 + $0x68] sm:$0xff]  }
  0x2e   :  { %1151 = vmatpush3.bf16.msra.mxu0 %v1321_v5  ;;  %v1330_v14 = vld [vmem:[#allocation6 + $0xd8] sm:$0xff]   ;;  %v1334_v18 = vld [vmem:[#allocation6 + $0xe0] sm:$0xff]   ;;  %v1337_v21 = vld [vmem:[#allocation6 + $0x28] sm:$0xff]   ;;  %p1465_p5 = por %p1464_p4, %p1463_p3 }
  0x2f   :  { %1152 = vmatprep.subr.bf16.mxu0 %v1324_v8  ;;  %v1331_v15 = vld [vmem:[#allocation6 + $0x98] sm:$0xff]   ;;  %v1335_v19 = vld [vmem:[#allocation6 + $0xa0] sm:$0xff]   ;;  %v1338_v22 = vld [vmem:[#allocation6 + $0xe8] sm:$0xff]  }
  0x30   :  { %1197 = vmatpush3.bf16.msra.mxu1 %v1323_v7  ;;  %v1339_v23 = vld [vmem:[#allocation6 + $0xa8] sm:$0xff]   ;;  %v1340_v24 = vld [vmem:[#allocation6 + $0x70] sm:$0xff]   ;;  %v1344_v28 = vld [vmem:[#allocation6 + $0x78] sm:$0xff]   ;;  %p1466_p6 = pnand %p1465_p5, %p1459_p2 }
  0x31   :  { %1198 = vmatprep.subr.bf16.mxu1 %v1326_v10  ;;  %v1341_v25 = vld [vmem:[#allocation6 + $0x30] sm:$0xff]   ;;  %v1345_v29 = vld [vmem:[#allocation6 + $0x38] sm:$0xff]   ;;  %v1354_v36 = vld [vmem:[#allocation6 + $0x140] sm:$0xff]  }
  0x32   :  { %1153 = vmatpush3.bf16.msra.mxu0 %v1325_v9  ;;  %v1342_v26 = vld [vmem:[#allocation6 + $0xf0] sm:$0xff]   ;;  %v1346_v30 = vld [vmem:[#allocation6 + $0xf8] sm:$0xff]   ;;  %v1355_v37 = vld [vmem:[#allocation6 + $0x100] sm:$0xff]  }
  0x33   :  { %1154 = vmatprep.subr.bf16.mxu0 %v1328_v12  ;;  %v1343_v27 = vld [vmem:[#allocation6 + $0xb0] sm:$0xff]   ;;  %v1350_v33 = vld [vmem:[#allocation6 + $0xb8] sm:$0xff]   ;;  %v1359_v40 = vld [vmem:[#allocation3 + $0x3c] ss:$24 sps:$4 sm:$0xff]  }
  0x34   :  { %1199 = vmatpush3.bf16.msra.mxu1 %v1327_v11  ;;  %v1347_v31 = vld [vmem:[#allocation3] ss:$24 sps:$4 sm:$0xff]   ;;  %v1349_v32 = vld [vmem:[#allocation3 + $0x4] ss:$24 sps:$4 sm:$0xff]   ;;  %v1356_v38 = vld [vmem:[#allocation3 + $0x34] ss:$24 sps:$4 sm:$0xff]  }
  0x35   :  { %1200 = vmatprep.subr.bf16.mxu1 %v1330_v14  ;;  %657 = vmatprep.mubr.bf16.mxu0 %v1349_v32  ;;  %v1351_v34 = vld [vmem:[#allocation3 + $0x8] ss:$24 sps:$4 sm:$0xff]   ;;  %v1353_v35 = vld [vmem:[#allocation3 + $0xc] ss:$24 sps:$4 sm:$0xff]   ;;  %v1361_v41 = vld [vmem:[#allocation6 + $0x148] sm:$0xff]   ;;  %v1516_v14 = vmov 0.0  }
  0x36   :  { %1155 = vmatpush3.bf16.msra.mxu0 %v1329_v13  ;;  %730 = vmatprep.mubr.bf16.mxu1 %v1353_v35  ;;  %v1358_v39 = vld [vmem:[#allocation3 + $0x30] ss:$24 sps:$4 sm:$0xff]   ;;  %v1363_v43 = vld [vmem:[#allocation6 + $0x108] sm:$0xff]   ;;  %v1364_v44 = vld [vmem:[#allocation6 + $0x150] sm:$0xff]  }
  0x37   :  { %1156 = vmatprep.subr.bf16.mxu0 %v1332_v16  ;;  %v1362_v42 = vld [vmem:[#allocation3 + $0x38] ss:$24 sps:$4 sm:$0xff]   ;;  %v1365_v45 = vld [vmem:[#allocation3 + $0x64] ss:$24 sps:$4 sm:$0xff]   ;;  %v1372_v49 = vld [vmem:[#allocation6 + $0x158] sm:$0xff]  }
  0x38   :  { %1201 = vmatpush3.bf16.msra.mxu1 %v1331_v15  ;;  %v1367_v46 = vld [vmem:[#allocation6 + $0x110] sm:$0xff]   ;;  %v1373_v50 = vld [vmem:[#allocation6 + $0x118] sm:$0xff]   ;;  %v1377_v53 = vld [vmem:[#allocation6 + $0x160] sm:$0xff]  }
  0x39   :  { %1202 = vmatprep.subr.bf16.mxu1 %v1334_v18  ;;  %v1368_v47 = vld [vmem:[#allocation3 + $0x60] ss:$24 sps:$4 sm:$0xff]   ;;  %v1369_v48 = vld [vmem:[#allocation3 + $0x6c] ss:$24 sps:$4 sm:$0xff]   ;;  %v1378_v54 = vld [vmem:[#allocation3 + $0x9c] ss:$24 sps:$4 sm:$0xff]  }
  0x3a   :  { %1157 = vmatpush3.bf16.msra.mxu0 %v1333_v17  ;;  %v1374_v51 = vld [vmem:[#allocation3 + $0x94] ss:$24 sps:$4 sm:$0xff]   ;;  %v1371_v52 = vld [vmem:[#allocation3 + $0x68] ss:$24 sps:$4 sm:$0xff]   ;;  %v1382_v56 = vld [vmem:[#allocation6 + $0x168] sm:$0xff]  }
  0x3b   :  { %1158 = vmatprep.subr.bf16.mxu0 %v1336_v20  ;;  %v1380_v55 = vld [vmem:[#allocation6 + $0x120] sm:$0xff]   ;;  %v1383_v58 = vld [vmem:[#allocation6 + $0x128] sm:$0xff]   ;;  %v1387_v60 = vld [vmem:[#allocation6 + $0x170] sm:$0xff]  }
  0x3c   :  { %1203 = vmatpush3.bf16.msra.mxu1 %v1335_v19  ;;  %v1376_v57 = vld [vmem:[#allocation3 + $0x90] ss:$24 sps:$4 sm:$0xff]   ;;  %v1384_v59 = vld [vmem:[#allocation3 + $0xc4] ss:$24 sps:$4 sm:$0xff]   ;;  %v1386_v1 = vld [vmem:[#allocation3 + $0xc0] ss:$24 sps:$4 sm:$0xff]  }
  0x3d   :  { %1204 = vmatprep.subr.bf16.mxu1 %v1338_v22  ;;  %v1381_v61 = vld [vmem:[#allocation3 + $0x98] ss:$24 sps:$4 sm:$0xff]   ;;  %v1388_v62 = vld [vmem:[#allocation3 + $0xcc] ss:$24 sps:$4 sm:$0xff]   ;;  %v1391_v4 = vld [vmem:[#allocation3 + $0xc8] ss:$24 sps:$4 sm:$0xff]  }
  0x3e   :  { %1159 = vmatpush3.bf16.msra.mxu0 %v1337_v21  ;;  %v1390_v63 = vld [vmem:[#allocation6 + $0x130] sm:$0xff]   ;;  %v1392_v0 = vld [vmem:[#allocation6 + $0x178] sm:$0xff]  }
  0x3f   :  { %1160 = vmatprep.subr.bf16.mxu0 %v1340_v24  ;;  %v1393_v2 = vld [vmem:[#allocation6 + $0x138] sm:$0xff]   ;;  %v1397_v6 = vld [vmem:[#allocation3 + $0x44] ss:$24 sps:$4 sm:$0xff]   ;;  %v1399_v7 = vld [vmem:[#allocation3 + $0x40] ss:$24 sps:$4 sm:$0xff]  }
  0x40   :  { %1205 = vmatpush3.bf16.msra.mxu1 %v1339_v23  ;;  %v1396_v3 = vld [vmem:[#allocation3 + $0x14] ss:$24 sps:$4 sm:$0xff]   ;;  %v1394_v5 = vld [vmem:[#allocation3 + $0x10] ss:$24 sps:$4 sm:$0xff]   ;;  %v1403_v10 = vld [vmem:[#allocation3 + $0xa4] ss:$24 sps:$4 sm:$0xff]  }
  0x41   :  { %1206 = vmatprep.subr.bf16.mxu1 %v1342_v26  ;;  %v1400_v8 = vld [vmem:[#allocation3 + $0x74] ss:$24 sps:$4 sm:$0xff]   ;;  %v1402_v9 = vld [vmem:[#allocation3 + $0x70] ss:$24 sps:$4 sm:$0xff]   ;;  %v1405_v11 = vld [vmem:[#allocation3 + $0xa0] ss:$24 sps:$4 sm:$0xff]  }
  0x42   :  { %1161 = vmatpush3.bf16.msra.mxu0 %v1341_v25  ;;  %v1406_v12 = vld [vmem:[#allocation3 + $0xd4] ss:$24 sps:$4 sm:$0xff]   ;;  %v1408_v13 = vld [vmem:[#allocation3 + $0xd0] ss:$24 sps:$4 sm:$0xff]   ;;  %v1587_v16 = vld [vmem:[%s1650_s2] ss:$0 sm:$0xff] }
  0x43   :  { %1162 = vmatprep.subr.bf16.mxu0 %v1344_v28 }
  0x44   :  { %1207 = vmatpush3.bf16.msra.mxu1 %v1343_v27 }
  0x45   :  { %1208 = vmatprep.subr.bf16.mxu1 %v1346_v30 }
  0x46   :  { %1163 = vmatpush3.bf16.msra.mxu0 %v1345_v29 }
  0x47   :  { %1240 = vmatprep.subr.bf16.mxu0 %v1354_v36 }
  0x48   :  { %1209 = vmatpush3.bf16.msra.mxu1 %v1350_v33 }
  0x49   :  { %658 = vmatmul.mubr.bf16.vlgmr.msra.gmra.mrb[0].mxu0 %v1347_v31  ;;  %1292 = vmatprep.subr.bf16.mxu1 %v1516_v14 }
  0x4a   :  { %1241 = vmatpush3.bf16.msra.mxu0 %v1355_v37  ;;  %665 = vmatprep.mubr.bf16.mxu0 %v1356_v38 }
  0x4b   :  { %731 = vmatmul.mubr.bf16.vlgmr.msra.gmra.mrb[0].mxu1 %v1351_v34  ;;  %1242 = vmatprep.subr.bf16.mxu0 %v1361_v41 }
  0x4c   :  { %738 = vmatprep.mubr.bf16.mxu1 %v1359_v40 }
  0x4e   :  { %1243 = vmatpush3.bf16.msra.mxu0 %v1363_v43 }
  0x4f   :  { %1244 = vmatprep.subr.bf16.mxu0 %v1364_v44 }
  0x51   :  { %666 = vmatmul.mubr.bf16.gmra.mrb[4].mxu0 %v1358_v39 }
  0x52   :  { %673 = vmatprep.mubr.bf16.mxu0 %v1365_v45  ;;  %1245 = vmatpush3.bf16.msra.mxu0 %v1367_v46 }
  0x53   :  { %739 = vmatmul.mubr.bf16.gmra.mrb[4].mxu1 %v1362_v42  ;;  %1246 = vmatprep.subr.bf16.mxu0 %v1372_v49 }
  0x54   :  { %746 = vmatprep.mubr.bf16.mxu1 %v1369_v48 }
  0x56   :  { %1247 = vmatpush3.bf16.msra.mxu0 %v1373_v50 }
  0x57   :  { %1248 = vmatprep.subr.bf16.mxu0 %v1377_v53 }
  0x59   :  { %674 = vmatmul.mubr.bf16.gmra.mrb[8].mxu0 %v1368_v47 }
  0x5a   :  { %681 = vmatprep.mubr.bf16.mxu0 %v1374_v51  ;;  %1249 = vmatpush3.bf16.msra.mxu0 %v1380_v55 }
  0x5b   :  { %747 = vmatmul.mubr.bf16.gmra.mrb[8].mxu1 %v1371_v52  ;;  %1250 = vmatprep.subr.bf16.mxu0 %v1382_v56 }
  0x5c   :  { %754 = vmatprep.mubr.bf16.mxu1 %v1378_v54 }
  0x5e   :  { %1251 = vmatpush3.bf16.msra.mxu0 %v1383_v58 }
  0x5f   :  { %1252 = vmatprep.subr.bf16.mxu0 %v1387_v60 }
  0x61   :  { %682 = vmatmul.mubr.bf16.gmra.mrb[12].mxu0 %v1376_v57 }
  0x62   :  { %689 = vmatprep.mubr.bf16.mxu0 %v1384_v59  ;;  %1253 = vmatpush3.bf16.msra.mxu0 %v1390_v63 }
  0x63   :  { %755 = vmatmul.mubr.bf16.gmra.mrb[12].mxu1 %v1381_v61  ;;  %1254 = vmatprep.subr.bf16.mxu0 %v1392_v0 }
  0x64   :  { %762 = vmatprep.mubr.bf16.mxu1 %v1388_v62 }
  0x66   :  { %1255 = vmatpush3.bf16.msra.mxu0 %v1393_v2 }
  0x69   :  { %690 = vmatmul.mubr.bf16.gmra.mrb[16].mxu0 %v1386_v1 }
  0x6a   :  { %803 = vmatprep.mubr.bf16.mxu0 %v1396_v3 }
  0x6b   :  { %763 = vmatmul.mubr.bf16.gmra.mrb[16].mxu1 %v1391_v4 }
  0x6c   :  { %1302 = vmatprep.mubr.msk.bf16.mxu1 %vm1517_vm0, %v1516_v14 }
  0x71   :  { %804 = vmatmul.mubr.bf16.vlgmr.msra.gmra.mrb[20].mxu0 %v1394_v5 }
  0x72   :  { %811 = vmatprep.mubr.bf16.mxu0 %v1397_v6 }
  0x79   :  { %812 = vmatmul.mubr.bf16.gmra.mrb[24].mxu0 %v1399_v7 }
  0x7a   :  { %819 = vmatprep.mubr.bf16.mxu0 %v1400_v8 }
  0x81   :  { %820 = vmatmul.mubr.bf16.gmra.mrb[28].mxu0 %v1402_v9 }
  0x82   :  { %827 = vmatprep.mubr.bf16.mxu0 %v1403_v10 }
  0x89   :  { %828 = vmatmul.mubr.bf16.gmra.mrb[32].mxu0 %v1405_v11 }
  0x8a   :  { %835 = vmatprep.mubr.bf16.mxu0 %v1406_v12 }
  0x91   :  { %836 = vmatmul.mubr.bf16.gmra.mrb[36].mxu0 %v1408_v13 }
 0x11c   :  { %v1164_v15 = vpop.f32.mrb[0].mxu0 }
 0x11d   :  { %v1165_v17 = vpop.f32.mrb[1].mxu0 }
 0x11e   :  { %v1166_v18 = vadd.f32 %v1165_v17, %v1164_v15  ;;  %v1167_v19 = vpop.f32.mrb[2].mxu0  ;;  %v1210_v20 = vpop.f32.mrb[0].mxu1 }
 0x11f   :  { %v1168_v21 = vpop.f32.mrb[3].mxu0  ;;  %v1211_v24 = vpop.f32.mrb[1].mxu1 }
 0x120   :  { %v660_v22 = vadd.f32 %v1166_v18, %v1587_v16  ;;  %v1169_v23 = vadd.f32 %v1168_v21, %v1167_v19  ;;  %v1212_v25 = vadd.f32 %v1211_v24, %v1210_v20  ;;  %v1213_v26 = vpop.f32.mrb[2].mxu1 }
 0x121   :  { %v1214_v28 = vpop.f32.mrb[3].mxu1 }
 0x122   :  { %v663_v27 = vadd.f32 %v1169_v23, %v1587_v16  ;;  %v1591_v29 = vadd.f32 %v1212_v25, %v660_v22  ;;  %v1215_v30 = vadd.f32 %v1214_v28, %v1213_v26 }
 0x124   :  { %v1170_v31 = vpop.f32.mrb[4].mxu0  ;;  %v1593_v32 = vadd.f32 %v1215_v30, %v663_v27 }
 0x125   :  { %v1171_v33 = vpop.f32.mrb[5].mxu0 }
 0x126   :  { %v1172_v34 = vadd.f32 %v1171_v33, %v1170_v31  ;;  %v1173_v35 = vpop.f32.mrb[6].mxu0  ;;  %v1216_v36 = vpop.f32.mrb[4].mxu1 }
 0x127   :  { %v1174_v37 = vpop.f32.mrb[7].mxu0  ;;  %v1217_v40 = vpop.f32.mrb[5].mxu1 }
 0x128   :  { %v668_v38 = vadd.f32 %v1172_v34, %v1587_v16  ;;  %v1175_v39 = vadd.f32 %v1174_v37, %v1173_v35  ;;  %v1218_v41 = vadd.f32 %v1217_v40, %v1216_v36  ;;  %v1219_v42 = vpop.f32.mrb[6].mxu1 }
 0x129   :  { %v1220_v44 = vpop.f32.mrb[7].mxu1 }
 0x12a   :  { %v671_v43 = vadd.f32 %v1175_v39, %v1587_v16  ;;  %v1597_v45 = vadd.f32 %v1218_v41, %v668_v38  ;;  %v1221_v46 = vadd.f32 %v1220_v44, %v1219_v42 }
 0x12c   :  { %v1176_v47 = vpop.f32.mrb[8].mxu0  ;;  %v1599_v48 = vadd.f32 %v1221_v46, %v671_v43 }
 0x12d   :  { %v1177_v49 = vpop.f32.mrb[9].mxu0 }
 0x12e   :  { %v1178_v50 = vadd.f32 %v1177_v49, %v1176_v47  ;;  %v1179_v51 = vpop.f32.mrb[10].mxu0  ;;  %v1222_v52 = vpop.f32.mrb[8].mxu1 }
 0x12f   :  { %v1180_v53 = vpop.f32.mrb[11].mxu0  ;;  %v1223_v56 = vpop.f32.mrb[9].mxu1 }
 0x130   :  { %v676_v54 = vadd.f32 %v1178_v50, %v1587_v16  ;;  %v1181_v55 = vadd.f32 %v1180_v53, %v1179_v51  ;;  %v1224_v57 = vadd.f32 %v1223_v56, %v1222_v52  ;;  %v1225_v58 = vpop.f32.mrb[10].mxu1 }
 0x131   :  { %v1226_v60 = vpop.f32.mrb[11].mxu1 }
 0x132   :  { %v679_v59 = vadd.f32 %v1181_v55, %v1587_v16  ;;  %v749_v61 = vadd.f32 %v1224_v57, %v676_v54  ;;  %v1227_v62 = vadd.f32 %v1226_v60, %v1225_v58 }
 0x134   :  { %v1182_v63 = vpop.f32.mrb[12].mxu0  ;;  %v752_v0 = vadd.f32 %v1227_v62, %v679_v59 }
 0x135   :  { %v1183_v1 = vpop.f32.mrb[13].mxu0 }
 0x136   :  { %v1184_v2 = vadd.f32 %v1183_v1, %v1182_v63  ;;  %v1185_v3 = vpop.f32.mrb[14].mxu0  ;;  %v1228_v4 = vpop.f32.mrb[12].mxu1 }
 0x137   :  { %v1186_v5 = vpop.f32.mrb[15].mxu0  ;;  %v1229_v8 = vpop.f32.mrb[13].mxu1 }
 0x138   :  { %v684_v6 = vadd.f32 %v1184_v2, %v1587_v16  ;;  %v1187_v7 = vadd.f32 %v1186_v5, %v1185_v3  ;;  %v1230_v9 = vadd.f32 %v1229_v8, %v1228_v4  ;;  %v1231_v10 = vpop.f32.mrb[14].mxu1 }
 0x139   :  { %v1232_v12 = vpop.f32.mrb[15].mxu1 }
 0x13a   :  { %v687_v11 = vadd.f32 %v1187_v7, %v1587_v16  ;;  %v757_v13 = vadd.f32 %v1230_v9, %v684_v6  ;;  %v1233_v15 = vadd.f32 %v1232_v12, %v1231_v10 }
 0x13c   :  { %v1188_v17 = vpop.f32.mrb[16].mxu0  ;;  %v760_v18 = vadd.f32 %v1233_v15, %v687_v11 }
 0x13d   :  { %v1189_v19 = vpop.f32.mrb[17].mxu0 }
 0x13e   :  { %v1190_v20 = vadd.f32 %v1189_v19, %v1188_v17  ;;  %v1191_v21 = vpop.f32.mrb[18].mxu0  ;;  %v1234_v22 = vpop.f32.mrb[16].mxu1 }
 0x13f   :  { %v1192_v23 = vpop.f32.mrb[19].mxu0  ;;  %v1235_v26 = vpop.f32.mrb[17].mxu1 }
 0x140   :  { %v692_v24 = vadd.f32 %v1190_v20, %v1587_v16  ;;  %v1193_v25 = vadd.f32 %v1192_v23, %v1191_v21  ;;  %v1236_v27 = vadd.f32 %v1235_v26, %v1234_v22  ;;  %v1237_v28 = vpop.f32.mrb[18].mxu1  ;;  %v894_v21 = vld [vmem:[%s1651_s3] sm:$0xf] }
 0x141   :  { %v1238_v31 = vpop.f32.mrb[19].mxu1 }
 0x142   :  { %v695_v30 = vadd.f32 %v1193_v25, %v1587_v16  ;;  %v765_v33 = vadd.f32 %v1236_v27, %v692_v24  ;;  %v1239_v34 = vadd.f32 %v1238_v31, %v1237_v28 }
 0x144   :  { %v1256_v35 = vpop.f32.mrb[20].mxu0  ;;  %v768_v36 = vadd.f32 %v1239_v34, %v695_v30 }
 0x145   :  { %v1257_v37 = vpop.f32.mrb[21].mxu0 }
 0x146   :  { %v1258_v38 = vadd.f32 %v1257_v37, %v1256_v35  ;;  %v1259_v39 = vpop.f32.mrb[22].mxu0 }
 0x147   :  { %v1260_v40 = vpop.f32.mrb[23].mxu0 }
 0x148   :  { %v806_v41 = vadd.f32 %v1258_v38, %v1591_v29  ;;  %v1261_v42 = vadd.f32 %v1260_v40, %v1259_v39 }
 0x14a   :  { %v809_v43 = vadd.f32 %v1261_v42, %v1593_v32 }
 0x14c   :  { %v1122_v44 = vpack.c.bf16 %v809_v43, %v806_v41  ;;  %v1262_v46 = vpop.f32.mrb[24].mxu0 }
 0x14d   :  { %v1263_v47 = vpop.f32.mrb[25].mxu0 }
 0x14e   :  { %1123 = vst [vmem:[#allocation8] sm:$0xff] %v1122_v44   ;;  %v1264_v49 = vadd.f32 %v1263_v47, %v1262_v46  ;;  %v1265_v16 = vpop.f32.mrb[26].mxu0 }
 0x14f   :  { %v1266_v50 = vpop.f32.mrb[27].mxu0 }
 0x150   :  { %v814_v51 = vadd.f32 %v1264_v49, %v1597_v45  ;;  %v1267_v52 = vadd.f32 %v1266_v50, %v1265_v16 }
 0x152   :  { %v817_v53 = vadd.f32 %v1267_v52, %v1599_v48 }
 0x154   :  { %v1127_v54 = vpack.c.bf16 %v817_v53, %v814_v51  ;;  %v1268_v55 = vpop.f32.mrb[28].mxu0 }
 0x155   :  { %v1269_v56 = vpop.f32.mrb[29].mxu0  ;;  %v1409_v57 = vld [vmem:[#allocation8] sm:$0xff]  }
 0x156   :  { %1144 = vst [vmem:[#allocation8 + $0x8] sm:$0xff] %v1127_v54   ;;  %v1270_v29 = vadd.f32 %v1269_v56, %v1268_v55  ;;  %v1271_v58 = vpop.f32.mrb[30].mxu0  ;;  %1293 = vmatpush3.bf16.msra.mxu1 %v1409_v57 }
 0x157   :  { %v1272_v32 = vpop.f32.mrb[31].mxu0  ;;  %1294 = vmatprep.subr.bf16.mxu1 %v1516_v14 }
 0x158   :  { %v822_v59 = vadd.f32 %v1270_v29, %v749_v61  ;;  %v1273_v60 = vadd.f32 %v1272_v32, %v1271_v58 }
 0x15a   :  { %v825_v62 = vadd.f32 %v1273_v60, %v752_v0 }
 0x15c   :  { %v1132_v63 = vpack.c.bf16 %v825_v62, %v822_v59  ;;  %v1274_v1 = vpop.f32.mrb[32].mxu0 }
 0x15d   :  { %v1275_v45 = vpop.f32.mrb[33].mxu0  ;;  %v1410_v2 = vld [vmem:[#allocation8 + $0x8] sm:$0xff]  }
 0x15e   :  { %1145 = vst [vmem:[#allocation8 + $0x10] sm:$0xff] %v1132_v63   ;;  %v1276_v48 = vadd.f32 %v1275_v45, %v1274_v1  ;;  %v1277_v3 = vpop.f32.mrb[34].mxu0  ;;  %1295 = vmatpush3.bf16.msra.mxu1 %v1410_v2 }
 0x15f   :  { %v1278_v4 = vpop.f32.mrb[35].mxu0  ;;  %1296 = vmatprep.subr.bf16.mxu1 %v1516_v14 }
 0x160   :  { %v830_v5 = vadd.f32 %v1276_v48, %v757_v13  ;;  %v1279_v6 = vadd.f32 %v1278_v4, %v1277_v3 }
 0x162   :  { %v833_v7 = vadd.f32 %v1279_v6, %v760_v18 }
 0x164   :  { %v1137_v8 = vpack.c.bf16 %v833_v7, %v830_v5  ;;  %v1280_v61 = vpop.f32.mrb[36].mxu0 }
 0x165   :  { %v1281_v9 = vpop.f32.mrb[37].mxu0  ;;  %v1411_v10 = vld [vmem:[#allocation8 + $0x10] sm:$0xff]  }
 0x166   :  { %1146 = vst [vmem:[#allocation8 + $0x18] sm:$0xff] %v1137_v8   ;;  %v1282_v0 = vadd.f32 %v1281_v9, %v1280_v61  ;;  %v1283_v11 = vpop.f32.mrb[38].mxu0  ;;  %1297 = vmatpush3.bf16.msra.mxu1 %v1411_v10 }
 0x167   :  { %v1284_v12 = vpop.f32.mrb[39].mxu0  ;;  %1298 = vmatprep.subr.bf16.mxu1 %v1516_v14 }
 0x168   :  { %v838_v15 = vadd.f32 %v1282_v0, %v765_v33  ;;  %v1285_v17 = vadd.f32 %v1284_v12, %v1283_v11 }
 0x16a   :  { %v841_v19 = vadd.f32 %v1285_v17, %v768_v36 }
 0x16c   :  { %v1142_v20 = vpack.c.bf16 %v841_v19, %v838_v15 }
 0x16d   :  { %v1412_v13 = vld [vmem:[#allocation8 + $0x18] sm:$0xff]  }
 0x16e   :  { %1147 = vst [vmem:[#allocation8 + $0x20] sm:$0xff] %v1142_v20   ;;  %1299 = vmatpush3.bf16.msra.mxu1 %v1412_v13 }
 0x16f   :  { %1300 = vmatprep.subr.bf16.mxu1 %v1516_v14 }
 0x175   :  { %v1413_v18 = vld [vmem:[#allocation8 + $0x20] sm:$0xff]  }
 0x176   :  { %1301 = vmatpush3.bf16.msra.mxu1 %v1413_v18 }
 0x179   :  { %1303 = vmatmul.mubr.msk.bf16.vlgmr.msra.gmra.mrb[20].mxu1 %vm937_vm1, %v894_v21 }
 0x17a   :  { %1469 = shalt.err (!%p1466_p6)
}
 0x17b   :  { %s1470_s7 = scalar_lea.hbm %s1653_s5, 640 }
 0x17c   :  { %p1471_p7 = scmp.ne.s32.totalorder %s1653_s5, %s1470_s7  ;;  %p1474_p8 = scmp.lt.u32.totalorder %s1470_s7, %s1653_s5 }
 0x17e   :  { %p1476_p9 = pnand %p1474_p8, %p1471_p7 }
 0x180   :  { %1479 = shalt.err (!%p1476_p9)
}
 0x181   :  { %993 = dma.vmem_to_hbm [thread:$0]  %s988_s27, 640, %s1653_s5, [#allocation5], %s1514_s0, %s1514_s0, %s1515_s21  }
 0x182   :  { %v906_v14 = vstv %s1652_s4  ;;  %s1519_s15 = smov [#allocation9]  }
 0x183   :  { %s1000_s16 = sshll.u32 %s1519_s15, 4  ;;  %s1001_s16 = int_to_ptr.vmem [resolvable:$true] %s1000_s16 }
 0x184   :  { %s1480_s17 = scalar_lea.vmem %s1001_s16, 128  ;;  %p1485_p11 = scmp.lt.s32.totalorder %s1001_s16, %s1001_s16 }
 0x185   :  { %p1481_p10 = scmp.ne.s32.totalorder %s1001_s16, %s1480_s17  ;;  %p1486_p12 = scmp.lt.s32.totalorder %s1480_s17, %s1480_s17 }
 0x187   :  { %p1487_p13 = por %p1486_p12, %p1485_p11 }
 0x189   :  { %p1488_p0 = pnand %p1487_p13, %p1481_p10 }
 0x24c   :  { %v975_v22 = vpop.f32.mrb[20].mxu1 }
 0x24d   :  { %v976_v23 = vadd.f32 %v975_v22, %v906_v14  ;;  %v1304_v24 = vpop.f32.mrb[21].mxu1 }
 0x24e   :  { %v978_v25 = vpop.f32.mrb[22].mxu1 }
 0x24f   :  { %981 = vst [vmem:[#allocation9] sm:$0xff] %v976_v23  ;;  %v1305_v26 = vpop.f32.mrb[23].mxu1 }
 0x250   :  { %1491 = shalt.err (!%p1488_p0)
}
 0x251   :  { %s1492_s4 = scalar_lea.hbm %s1654_s6, 128 }
 0x252   :  { %p1493_p1 = scmp.ne.s32.totalorder %s1654_s6, %s1492_s4  ;;  %p1496_p2 = scmp.lt.u32.totalorder %s1492_s4, %s1654_s6 }
 0x254   :  { %p1498_p3 = pnand %p1496_p2, %p1493_p1 }
 0x256   :  { %1501 = shalt.err (!%p1498_p3)
}
 0x257   :  { %1003 = dma.vmem_to_hbm [thread:$0]  %s1001_s16, 128, %s1654_s6, [#allocation10]  }
 0x258   :  { %1506 = dma.done.wait [#allocation5], 640  }
 0x259   :  { %1507 = vsyncadd [#allocation5], 4294966656 }
 0x25a   :  { %1508 = dma.done.wait [#allocation10], 128  }
 0x25b   :  { %1509 = vsyncadd [#allocation10], 4294967168 }
 0x25c   :  { %1010 = vsyncpa [#allocation4], 1 }
 0x25d   :  { %1011 = vsyncpa [#allocation7], 1 }
 0x25e   :  { %1012 = vsyncpa [#allocation5], 1 }
 0x25f   :  { %1013 = vsyncpa [#allocation10], 1 }

</bundles_post_ra>
